<compile_context>
chip_gen: v5e
topology: v5e:2x2
jax: 0.10.0
libtpu: 0.0.40
codegen_flags: <defaults>
</compile_context>

<pallas_src>
import functools

import jax
import jax.numpy as jnp
import numpy as np
from jax import lax
from jax.experimental import pallas as pl
from jax.experimental.pallas import tpu as pltpu


# ---------------------------- fused Pallas kernel --------------------------- #

def _bottleneck_kernel(x_ref, w1_ref, w2_ref, w3_ref, b_ref, mask_ref, o_ref,
                       *, H, W, P, bias_off):
    ipb = x_ref.shape[0]                     # whole images in this lane-block
    M = H * W
    Mb = ipb * M                             # fused lane width of this block
    Cexp = w3_ref.shape[0]
    off1, off2, off3 = bias_off
    cd = w1_ref.dtype                        # matmul compute dtype (f32 or bf16)

    # Fuse the block's images along the lane axis -> (Cin, ipb*M).
    # Lane offsets are multiples of M (>=128), so this is an unmasked,
    # in-register concat; residual stays in f32.
    if ipb == 1:
        x = x_ref[0]
    else:
        x = jnp.concatenate([x_ref[i] for i in range(ipb)], axis=1)

    b1 = b_ref[off1:off1 + P, :]             # (P, 1)   f32
    b2 = b_ref[off2:off2 + P, :]             # (P, 1)   f32
    b3 = b_ref[off3:off3 + Cexp, :]          # (4P, 1)  f32

    # ---- conv1 (1x1): BN1 scale folded into w1, bias-only epilogue ----------
    y1 = jnp.dot(w1_ref[...], x.astype(cd), preferred_element_type=jnp.float32)
    y1 = jnp.maximum(y1 + b1, 0.0)           # (P, Mb) f32
    y1c = y1.astype(cd)

    # ---- conv2 (3x3, stride=1, SAME): 9 accumulated shifted 1x1 convs -------
    #   out2 = sum_t  mask_t * roll(W_t @ y1, -s_t)
    # mask/roll commute with the per-tap matmul, so no (9P, M) im2col tensor,
    # no VMEM scratch, no sub-tile masked stores.  mask_ref rows are 0/1 f32
    # precomputed from static H, W and tiled per image, so lane-rolls cannot
    # leak across image boundaries inside the fused lane axis.
    y2 = jnp.dot(w2_ref[4], y1c, preferred_element_type=jnp.float32)   # center tap
    t = 0
    for dy in (-1, 0, 1):
        for dx in (-1, 0, 1):
            if dy == 0 and dx == 0:
                t += 1
                continue
            s = dy * W + dx                                            # flat offset
            u = jnp.dot(w2_ref[t], y1c, preferred_element_type=jnp.float32)
            u = pltpu.roll(u, (-s) % Mb, axis=1)                       # u[:, m] <- u[:, m+s]
            y2 = y2 + u * mask_ref[pl.ds(t, 1), :]
            t += 1
    y2 = jnp.maximum(y2 + b2, 0.0)           # (P, Mb) f32

    # ---- conv3 (1x1) + bias + identity residual + relu ----------------------
    y3 = jnp.dot(w3_ref[...], y2.astype(cd), preferred_element_type=jnp.float32)
    out = jnp.maximum(y3 + b3 + x, 0.0).astype(o_ref.dtype)            # (4P, Mb)

    # Lane-dense, 128-aligned per-image writebacks.
    if ipb == 1:
        o_ref[0] = out
    else:
        for i in range(ipb):
            o_ref[i] = out[:, i * M:(i + 1) * M]


# ---------------------------- host-side helpers ----------------------------- #

def _bias_offsets(p):
    """8-row aligned segment offsets inside the packed bias buffer."""
    r = -(-p // 8) * 8
    return (0, r, 2 * r)


def _build_taps_mask(H, W, images_per_block):
    """(9, ipb*H*W) 0/1 f32 validity masks for the 9 conv2 taps (trace-time)."""
    M = H * W
    idx = np.arange(M)
    hh, ww = idx // W, idx % W
    rows = []
    for dy in (-1, 0, 1):
        for dx in (-1, 0, 1):
            m = np.ones(M, np.bool_)
            if dy == -1:
                m &= hh >= 1
            elif dy == 1:
                m &= hh <= H - 2
            if dx == -1:
                m &= ww >= 1
            elif dx == 1:
                m &= ww <= W - 2
            rows.append(m)
    mask = np.stack(rows).astype(np.float32)           # (9, M)
    return np.tile(mask, (1, images_per_block))        # (9, ipb*M)


def _default_lane_blocks(n_images):
    # v7x has 2 TensorCores per chip -> give each TC its own lane-block.
    # v5e/v6e have a single TC, so one wide-lane step minimizes the ~0.35us
    # per-grid-step overhead and doubles lane utilization of every op.
    try:
        kind = jax.devices()[0].device_kind.lower()
    except Exception:
        kind = ""
    if "v7" in kind and n_images >= 2 and n_images % 2 == 0:
        return 2
    return 1


def pack_params(params, use_bf16=False):
    """One-time parameter prep (amortized; NOT per forward call):
    fold eval-mode BN scales into the conv weights, repack conv2 as
    (9, P_out, P_in) for tap indexing, and pack the three BN biases into a
    single (R, 1) buffer.  use_bf16=True casts the matmul weights to bf16
    (f32 accumulate stays in-kernel) for the v6e/v7x MXU."""
    w1, w2, w3 = params["w1"], params["w2"], params["w3"]       # (P,Cin), HWIO, (4P,P)
    p, cexp = w1.shape[0], w3.shape[0]

    w1f = w1 * params["s1"]                                     # (P, Cin)
    w2f = jnp.transpose(w2, (0, 1, 3, 2)).reshape(9, p, p)      # (t, O, I), t = kh*3+kw
    w2f = w2f * params["s2"].reshape(1, p, 1)
    w3f = w3 * params["s3"]                                     # (4P, P)
    cd = jnp.bfloat16 if use_bf16 else w1.dtype

    off = _bias_offsets(p)
    bias = jnp.zeros((off[2] + cexp, 1), jnp.float32)
    bias = bias.at[off[0]:off[0] + p].set(params["b1"])
    bias = bias.at[off[1]:off[1] + p].set(params["b2"])
    bias = bias.at[off[2]:off[2] + cexp].set(params["b3"])

    return dict(w1=w1f.astype(cd), w2=w2f.astype(cd), w3=w3f.astype(cd), bias=bias)


# ---------------------------- module forward -------------------------------- #

def bottleneck_forward(x_nchw, packed, num_lane_blocks=None):
    n, cin, h, w = x_nchw.shape
    m = h * w
    w1, w2, w3, bias = packed["w1"], packed["w2"], packed["w3"], packed["bias"]
    p = w1.shape[0]
    cexp = w3.shape[0]
    assert cin == cexp, "identity residual requires inplanes == planes * expansion"
    # TODO(synk): stride>1 / downsample projection branch not implemented.

    if num_lane_blocks is None:
        num_lane_blocks = _default_lane_blocks(n)
    if n % num_lane_blocks != 0:
        num_lane_blocks = 1
    ipb = n // num_lane_blocks                     # whole images per grid step

    x3 = x_nchw.reshape(n, cin, m)                 # NCHW -> (N, C, M): free
    mask = _build_taps_mask(h, w, ipb)             # trace-time constant, (9, ipb*m)
    bias_off = _bias_offsets(p)

    kernel = functools.partial(_bottleneck_kernel, H=h, W=w, P=p, bias_off=bias_off)

    out = pl.pallas_call(
        kernel,
        out_shape=jax.ShapeDtypeStruct((n, cexp, m), x_nchw.dtype),
        grid=(num_lane_blocks,),
        in_specs=[
            pl.BlockSpec((ipb, cin, m), lambda b: (b, 0, 0)),   # x (ipb images)
            pl.BlockSpec((p, cin), lambda b: (0, 0)),           # w1 (BN1 folded)
            pl.BlockSpec((9, p, p), lambda b: (0, 0, 0)),       # w2 taps (BN2 folded)
            pl.BlockSpec((cexp, p), lambda b: (0, 0)),          # w3 (BN3 folded)
            pl.BlockSpec(bias.shape, lambda b: (0, 0)),         # packed BN biases
            pl.BlockSpec(mask.shape, lambda b: (0, 0)),         # 9 boundary masks
        ],
        out_specs=pl.BlockSpec((ipb, cexp, m), lambda b: (b, 0, 0)),
        compiler_params=pltpu.CompilerParams(
            dimension_semantics=("parallel",)),
    )(x3, w1, w2, w3, bias, mask)

    return out.reshape(n, cexp, h, w)


# ---------------------------- params & reference ---------------------------- #

def init_params(key, inplanes, planes, eps=1e-5):
    exp = 4
    ks = jax.random.split(key, 15)

    def bn_fold(k0, k1, k2, k3, c):
        gamma = 1.0 + 0.1 * jax.random.normal(k0, (c,), jnp.float32)
        beta = 0.1 * jax.random.normal(k1, (c,), jnp.float32)
        mean = 0.1 * jax.random.normal(k2, (c,), jnp.float32)
        var = 1.0 + 0.1 * jnp.abs(jax.random.normal(k3, (c,), jnp.float32))
        scale = gamma / jnp.sqrt(var + eps)
        bias = beta - mean * scale
        return scale.reshape(c, 1), bias.reshape(c, 1)

    w1 = 0.1 * jax.random.normal(ks[0], (planes, inplanes), jnp.float32)        # (P, Cin)
    w2 = 0.1 * jax.random.normal(ks[1], (3, 3, planes, planes), jnp.float32)    # HWIO
    w3 = 0.1 * jax.random.normal(ks[2], (planes * exp, planes), jnp.float32)    # (4P, P)
    s1, b1 = bn_fold(ks[3], ks[4], ks[5], ks[6], planes)
    s2, b2 = bn_fold(ks[7], ks[8], ks[9], ks[10], planes)
    s3, b3 = bn_fold(ks[11], ks[12], ks[13], ks[14], planes * exp)
    return dict(w1=w1, w2=w2, w3=w3, s1=s1, b1=b1, s2=s2, b2=b2, s3=s3, b3=b3)


def ref_forward(x_nchw, params):
    """Pure-JAX mirror of the PyTorch module (eval-mode BN), NCHW/OIHW."""
    dn = ("NCHW", "OIHW", "NCHW")
    w1 = params["w1"][:, :, None, None]                     # (P, Cin, 1, 1)
    w2 = jnp.transpose(params["w2"], (3, 2, 0, 1))          # HWIO -> OIHW
    w3 = params["w3"][:, :, None, None]                     # (4P, P, 1, 1)

    def bn(y, s, b):
        return y * s.reshape(1, -1, 1, 1) + b.reshape(1, -1, 1, 1)

    y = lax.conv_general_dilated(x_nchw, w1, (1, 1), "VALID", dimension_numbers=dn)
    y = jnp.maximum(bn(y, params["s1"], params["b1"]), 0.0)
    y = lax.conv_general_dilated(y, w2, (1, 1), ((1, 1), (1, 1)), dimension_numbers=dn)
    y = jnp.maximum(bn(y, params["s2"], params["b2"]), 0.0)
    y = lax.conv_general_dilated(y, w3, (1, 1), "VALID", dimension_numbers=dn)
    y = jnp.maximum(bn(y, params["s3"], params["b3"]) + x_nchw, 0.0)
    return y


if __name__ == "__main__":
    key = jax.random.PRNGKey(0)
    kx, kp = jax.random.split(key)

    # Bottleneck(inplanes=16, planes=4, stride=1, downsample=None); input NCHW.
    # (inplanes == planes * expansion so the identity residual is valid.)
    N, INPLANES, H, W = 2, 16, 16, 16
    PLANES = 4
    x = jax.random.normal(kx, (N, INPLANES, H, W), jnp.float32)
    params = init_params(kp, INPLANES, PLANES)

    # One-time param prep (BN fold + packing).  Set use_bf16=True on v6e/v7x if
    # the downstream tolerance allows bf16 matmul operands.
    packed = pack_params(params, use_bf16=False)

    fwd = jax.jit(bottleneck_forward)
    out = jax.block_until_ready(fwd(x, packed))

    assert out.shape == (N, PLANES * 4, H, W), out.shape
    ref = ref_forward(x, params)
    np.testing.assert_allclose(np.asarray(out), np.asarray(ref), rtol=2e-3, atol=2e-3)

    print("KERNEL_OK")
</pallas_src>

<mosaic_0001>
module attributes {stable_mosaic.version = 11 : i64} {
  func.func @_bottleneck_kernel(%arg0: i32, %arg1: memref<2x16x256xf32, #tpu.memory_space<vmem>>, %arg2: memref<4x16xf32, #tpu.memory_space<vmem>>, %arg3: memref<9x4x4xf32, #tpu.memory_space<vmem>>, %arg4: memref<16x4xf32, #tpu.memory_space<vmem>>, %arg5: memref<32x1xf32, #tpu.memory_space<vmem>>, %arg6: memref<9x512xf32, #tpu.memory_space<vmem>>, %arg7: memref<2x16x256xf32, #tpu.memory_space<vmem>>) attributes {dimension_semantics = [#tpu.dimension_semantics<parallel>], iteration_bounds = array<i64: 1>, scalar_prefetch = 0 : i64, scratch_operands = 0 : i64, tpu.core_type = #tpu.core_type<tc>, window_params = [{transform_indices = @transform_0, window_bounds = array<i64: 2, 16, 256>}, {pipeline_mode = #tpu.pipeline_mode<synchronous>, transform_indices = @transform_1, window_bounds = array<i64: 4, 16>}, {pipeline_mode = #tpu.pipeline_mode<synchronous>, transform_indices = @transform_2, window_bounds = array<i64: 9, 4, 4>}, {pipeline_mode = #tpu.pipeline_mode<synchronous>, transform_indices = @transform_3, window_bounds = array<i64: 16, 4>}, {pipeline_mode = #tpu.pipeline_mode<synchronous>, transform_indices = @transform_4, window_bounds = array<i64: 32, 1>}, {pipeline_mode = #tpu.pipeline_mode<synchronous>, transform_indices = @transform_5, window_bounds = array<i64: 9, 512>}, {transform_indices = @transform_6, window_bounds = array<i64: 2, 16, 256>}]} {
    %c0 = arith.constant 0 : index
    %c0_0 = arith.constant 0 : index
    %c0_1 = arith.constant 0 : index
    %0 = vector.load %arg1[%c0, %c0_0, %c0_1] : memref<2x16x256xf32, #tpu.memory_space<vmem>>, vector<1x16x256xf32>
    %1 = vector.shape_cast %0 : vector<1x16x256xf32> to vector<16x256xf32>
    %c1 = arith.constant 1 : index
    %c0_2 = arith.constant 0 : index
    %c0_3 = arith.constant 0 : index
    %2 = vector.load %arg1[%c1, %c0_2, %c0_3] : memref<2x16x256xf32, #tpu.memory_space<vmem>>, vector<1x16x256xf32>
    %3 = vector.shape_cast %2 : vector<1x16x256xf32> to vector<16x256xf32>
    %4 = tpu.concatenate %1, %3 in 1 : vector<16x256xf32>, vector<16x256xf32> -> vector<16x512xf32>
    %c0_4 = arith.constant 0 : index
    %c0_5 = arith.constant 0 : index
    %5 = vector.load %arg5[%c0_4, %c0_5] : memref<32x1xf32, #tpu.memory_space<vmem>>, vector<4x1xf32>
    %c8 = arith.constant 8 : index
    %c0_6 = arith.constant 0 : index
    %6 = vector.load %arg5[%c8, %c0_6] : memref<32x1xf32, #tpu.memory_space<vmem>>, vector<4x1xf32>
    %c16 = arith.constant 16 : index
    %c0_7 = arith.constant 0 : index
    %7 = vector.load %arg5[%c16, %c0_7] : memref<32x1xf32, #tpu.memory_space<vmem>>, vector<16x1xf32>
    %c0_8 = arith.constant 0 : index
    %c0_9 = arith.constant 0 : index
    %8 = vector.load %arg2[%c0_8, %c0_9] : memref<4x16xf32, #tpu.memory_space<vmem>>, vector<4x16xf32>
    %cst = arith.constant dense<0.000000e+00> : vector<4x512xf32>
    %9 = tpu.matmul %8, %4, %cst {dimension_numbers = #tpu.dot_dimension_numbers<[1], [0], [0], [1], [0, 0, 1, 1], [], []>} : vector<4x16xf32>, vector<16x512xf32>, vector<4x512xf32> -> vector<4x512xf32>
    %10 = vector.broadcast %5 : vector<4x1xf32> to vector<4x512xf32>
    %11 = arith.addf %9, %10 : vector<4x512xf32>
    %cst_10 = arith.constant 0.000000e+00 : f32
    %12 = vector.broadcast %cst_10 : f32 to vector<4x512xf32>
    %13 = arith.maximumf %11, %12 : vector<4x512xf32>
    %c4 = arith.constant 4 : index
    %c0_11 = arith.constant 0 : index
    %c0_12 = arith.constant 0 : index
    %14 = vector.load %arg3[%c4, %c0_11, %c0_12] : memref<9x4x4xf32, #tpu.memory_space<vmem>>, vector<1x4x4xf32>
    %15 = vector.shape_cast %14 : vector<1x4x4xf32> to vector<4x4xf32>
    %cst_13 = arith.constant dense<0.000000e+00> : vector<4x512xf32>
    %16 = tpu.matmul %15, %13, %cst_13 {dimension_numbers = #tpu.dot_dimension_numbers<[1], [0], [0], [1], [0, 0, 1, 1], [], []>} : vector<4x4xf32>, vector<4x512xf32>, vector<4x512xf32> -> vector<4x512xf32>
    %c0_14 = arith.constant 0 : index
    %c0_15 = arith.constant 0 : index
    %c0_16 = arith.constant 0 : index
    %17 = vector.load %arg3[%c0_14, %c0_15, %c0_16] : memref<9x4x4xf32, #tpu.memory_space<vmem>>, vector<1x4x4xf32>
    %18 = vector.shape_cast %17 : vector<1x4x4xf32> to vector<4x4xf32>
    %cst_17 = arith.constant dense<0.000000e+00> : vector<4x512xf32>
    %19 = tpu.matmul %18, %13, %cst_17 {dimension_numbers = #tpu.dot_dimension_numbers<[1], [0], [0], [1], [0, 0, 1, 1], [], []>} : vector<4x4xf32>, vector<4x512xf32>, vector<4x512xf32> -> vector<4x512xf32>
    %c17_i32 = arith.constant 17 : i32
    %20 = tpu.dynamic_rotate %19 by %c17_i32 dim 1 : vector<4x512xf32>, i32 -> vector<4x512xf32>
    %c0_18 = arith.constant 0 : index
    %c0_19 = arith.constant 0 : index
    %21 = vector.load %arg6[%c0_18, %c0_19] : memref<9x512xf32, #tpu.memory_space<vmem>>, vector<1x512xf32>
    %22 = vector.broadcast %21 : vector<1x512xf32> to vector<4x512xf32>
    %23 = arith.mulf %20, %22 : vector<4x512xf32>
    %24 = arith.addf %16, %23 : vector<4x512xf32>
    %c1_20 = arith.constant 1 : index
    %c0_21 = arith.constant 0 : index
    %c0_22 = arith.constant 0 : index
    %25 = vector.load %arg3[%c1_20, %c0_21, %c0_22] : memref<9x4x4xf32, #tpu.memory_space<vmem>>, vector<1x4x4xf32>
    %26 = vector.shape_cast %25 : vector<1x4x4xf32> to vector<4x4xf32>
    %cst_23 = arith.constant dense<0.000000e+00> : vector<4x512xf32>
    %27 = tpu.matmul %26, %13, %cst_23 {dimension_numbers = #tpu.dot_dimension_numbers<[1], [0], [0], [1], [0, 0, 1, 1], [], []>} : vector<4x4xf32>, vector<4x512xf32>, vector<4x512xf32> -> vector<4x512xf32>
    %c16_i32 = arith.constant 16 : i32
    %28 = tpu.dynamic_rotate %27 by %c16_i32 dim 1 : vector<4x512xf32>, i32 -> vector<4x512xf32>
    %c1_24 = arith.constant 1 : index
    %c0_25 = arith.constant 0 : index
    %29 = vector.load %arg6[%c1_24, %c0_25] : memref<9x512xf32, #tpu.memory_space<vmem>>, vector<1x512xf32>
    %30 = vector.broadcast %29 : vector<1x512xf32> to vector<4x512xf32>
    %31 = arith.mulf %28, %30 : vector<4x512xf32>
    %32 = arith.addf %24, %31 : vector<4x512xf32>
    %c2 = arith.constant 2 : index
    %c0_26 = arith.constant 0 : index
    %c0_27 = arith.constant 0 : index
    %33 = vector.load %arg3[%c2, %c0_26, %c0_27] : memref<9x4x4xf32, #tpu.memory_space<vmem>>, vector<1x4x4xf32>
    %34 = vector.shape_cast %33 : vector<1x4x4xf32> to vector<4x4xf32>
    %cst_28 = arith.constant dense<0.000000e+00> : vector<4x512xf32>
    %35 = tpu.matmul %34, %13, %cst_28 {dimension_numbers = #tpu.dot_dimension_numbers<[1], [0], [0], [1], [0, 0, 1, 1], [], []>} : vector<4x4xf32>, vector<4x512xf32>, vector<4x512xf32> -> vector<4x512xf32>
    %c15_i32 = arith.constant 15 : i32
    %36 = tpu.dynamic_rotate %35 by %c15_i32 dim 1 : vector<4x512xf32>, i32 -> vector<4x512xf32>
    %c2_29 = arith.constant 2 : index
    %c0_30 = arith.constant 0 : index
    %37 = vector.load %arg6[%c2_29, %c0_30] : memref<9x512xf32, #tpu.memory_space<vmem>>, vector<1x512xf32>
    %38 = vector.broadcast %37 : vector<1x512xf32> to vector<4x512xf32>
    %39 = arith.mulf %36, %38 : vector<4x512xf32>
    %40 = arith.addf %32, %39 : vector<4x512xf32>
    %c3 = arith.constant 3 : index
    %c0_31 = arith.constant 0 : index
    %c0_32 = arith.constant 0 : index
    %41 = vector.load %arg3[%c3, %c0_31, %c0_32] : memref<9x4x4xf32, #tpu.memory_space<vmem>>, vector<1x4x4xf32>
    %42 = vector.shape_cast %41 : vector<1x4x4xf32> to vector<4x4xf32>
    %cst_33 = arith.constant dense<0.000000e+00> : vector<4x512xf32>
    %43 = tpu.matmul %42, %13, %cst_33 {dimension_numbers = #tpu.dot_dimension_numbers<[1], [0], [0], [1], [0, 0, 1, 1], [], []>} : vector<4x4xf32>, vector<4x512xf32>, vector<4x512xf32> -> vector<4x512xf32>
    %c1_i32 = arith.constant 1 : i32
    %44 = tpu.dynamic_rotate %43 by %c1_i32 dim 1 : vector<4x512xf32>, i32 -> vector<4x512xf32>
    %c3_34 = arith.constant 3 : index
    %c0_35 = arith.constant 0 : index
    %45 = vector.load %arg6[%c3_34, %c0_35] : memref<9x512xf32, #tpu.memory_space<vmem>>, vector<1x512xf32>
    %46 = vector.broadcast %45 : vector<1x512xf32> to vector<4x512xf32>
    %47 = arith.mulf %44, %46 : vector<4x512xf32>
    %48 = arith.addf %40, %47 : vector<4x512xf32>
    %c5 = arith.constant 5 : index
    %c0_36 = arith.constant 0 : index
    %c0_37 = arith.constant 0 : index
    %49 = vector.load %arg3[%c5, %c0_36, %c0_37] : memref<9x4x4xf32, #tpu.memory_space<vmem>>, vector<1x4x4xf32>
    %50 = vector.shape_cast %49 : vector<1x4x4xf32> to vector<4x4xf32>
    %cst_38 = arith.constant dense<0.000000e+00> : vector<4x512xf32>
    %51 = tpu.matmul %50, %13, %cst_38 {dimension_numbers = #tpu.dot_dimension_numbers<[1], [0], [0], [1], [0, 0, 1, 1], [], []>} : vector<4x4xf32>, vector<4x512xf32>, vector<4x512xf32> -> vector<4x512xf32>
    %c511_i32 = arith.constant 511 : i32
    %52 = tpu.dynamic_rotate %51 by %c511_i32 dim 1 : vector<4x512xf32>, i32 -> vector<4x512xf32>
    %c5_39 = arith.constant 5 : index
    %c0_40 = arith.constant 0 : index
    %53 = vector.load %arg6[%c5_39, %c0_40] : memref<9x512xf32, #tpu.memory_space<vmem>>, vector<1x512xf32>
    %54 = vector.broadcast %53 : vector<1x512xf32> to vector<4x512xf32>
    %55 = arith.mulf %52, %54 : vector<4x512xf32>
    %56 = arith.addf %48, %55 : vector<4x512xf32>
    %c6 = arith.constant 6 : index
    %c0_41 = arith.constant 0 : index
    %c0_42 = arith.constant 0 : index
    %57 = vector.load %arg3[%c6, %c0_41, %c0_42] : memref<9x4x4xf32, #tpu.memory_space<vmem>>, vector<1x4x4xf32>
    %58 = vector.shape_cast %57 : vector<1x4x4xf32> to vector<4x4xf32>
    %cst_43 = arith.constant dense<0.000000e+00> : vector<4x512xf32>
    %59 = tpu.matmul %58, %13, %cst_43 {dimension_numbers = #tpu.dot_dimension_numbers<[1], [0], [0], [1], [0, 0, 1, 1], [], []>} : vector<4x4xf32>, vector<4x512xf32>, vector<4x512xf32> -> vector<4x512xf32>
    %c497_i32 = arith.constant 497 : i32
    %60 = tpu.dynamic_rotate %59 by %c497_i32 dim 1 : vector<4x512xf32>, i32 -> vector<4x512xf32>
    %c6_44 = arith.constant 6 : index
    %c0_45 = arith.constant 0 : index
    %61 = vector.load %arg6[%c6_44, %c0_45] : memref<9x512xf32, #tpu.memory_space<vmem>>, vector<1x512xf32>
    %62 = vector.broadcast %61 : vector<1x512xf32> to vector<4x512xf32>
    %63 = arith.mulf %60, %62 : vector<4x512xf32>
    %64 = arith.addf %56, %63 : vector<4x512xf32>
    %c7 = arith.constant 7 : index
    %c0_46 = arith.constant 0 : index
    %c0_47 = arith.constant 0 : index
    %65 = vector.load %arg3[%c7, %c0_46, %c0_47] : memref<9x4x4xf32, #tpu.memory_space<vmem>>, vector<1x4x4xf32>
    %66 = vector.shape_cast %65 : vector<1x4x4xf32> to vector<4x4xf32>
    %cst_48 = arith.constant dense<0.000000e+00> : vector<4x512xf32>
    %67 = tpu.matmul %66, %13, %cst_48 {dimension_numbers = #tpu.dot_dimension_numbers<[1], [0], [0], [1], [0, 0, 1, 1], [], []>} : vector<4x4xf32>, vector<4x512xf32>, vector<4x512xf32> -> vector<4x512xf32>
    %c496_i32 = arith.constant 496 : i32
    %68 = tpu.dynamic_rotate %67 by %c496_i32 dim 1 : vector<4x512xf32>, i32 -> vector<4x512xf32>
    %c7_49 = arith.constant 7 : index
    %c0_50 = arith.constant 0 : index
    %69 = vector.load %arg6[%c7_49, %c0_50] : memref<9x512xf32, #tpu.memory_space<vmem>>, vector<1x512xf32>
    %70 = vector.broadcast %69 : vector<1x512xf32> to vector<4x512xf32>
    %71 = arith.mulf %68, %70 : vector<4x512xf32>
    %72 = arith.addf %64, %71 : vector<4x512xf32>
    %c8_51 = arith.constant 8 : index
    %c0_52 = arith.constant 0 : index
    %c0_53 = arith.constant 0 : index
    %73 = vector.load %arg3[%c8_51, %c0_52, %c0_53] : memref<9x4x4xf32, #tpu.memory_space<vmem>>, vector<1x4x4xf32>
    %74 = vector.shape_cast %73 : vector<1x4x4xf32> to vector<4x4xf32>
    %cst_54 = arith.constant dense<0.000000e+00> : vector<4x512xf32>
    %75 = tpu.matmul %74, %13, %cst_54 {dimension_numbers = #tpu.dot_dimension_numbers<[1], [0], [0], [1], [0, 0, 1, 1], [], []>} : vector<4x4xf32>, vector<4x512xf32>, vector<4x512xf32> -> vector<4x512xf32>
    %c495_i32 = arith.constant 495 : i32
    %76 = tpu.dynamic_rotate %75 by %c495_i32 dim 1 : vector<4x512xf32>, i32 -> vector<4x512xf32>
    %c8_55 = arith.constant 8 : index
    %c0_56 = arith.constant 0 : index
    %77 = vector.load %arg6[%c8_55, %c0_56] : memref<9x512xf32, #tpu.memory_space<vmem>>, vector<1x512xf32>
    %78 = vector.broadcast %77 : vector<1x512xf32> to vector<4x512xf32>
    %79 = arith.mulf %76, %78 : vector<4x512xf32>
    %80 = arith.addf %72, %79 : vector<4x512xf32>
    %81 = vector.broadcast %6 : vector<4x1xf32> to vector<4x512xf32>
    %82 = arith.addf %80, %81 : vector<4x512xf32>
    %cst_57 = arith.constant 0.000000e+00 : f32
    %83 = vector.broadcast %cst_57 : f32 to vector<4x512xf32>
    %84 = arith.maximumf %82, %83 : vector<4x512xf32>
    %c0_58 = arith.constant 0 : index
    %c0_59 = arith.constant 0 : index
    %85 = vector.load %arg4[%c0_58, %c0_59] : memref<16x4xf32, #tpu.memory_space<vmem>>, vector<16x4xf32>
    %cst_60 = arith.constant dense<0.000000e+00> : vector<16x512xf32>
    %86 = tpu.matmul %85, %84, %cst_60 {dimension_numbers = #tpu.dot_dimension_numbers<[1], [0], [0], [1], [0, 0, 1, 1], [], []>} : vector<16x4xf32>, vector<4x512xf32>, vector<16x512xf32> -> vector<16x512xf32>
    %87 = vector.broadcast %7 : vector<16x1xf32> to vector<16x512xf32>
    %88 = arith.addf %86, %87 : vector<16x512xf32>
    %89 = arith.addf %88, %4 : vector<16x512xf32>
    %cst_61 = arith.constant 0.000000e+00 : f32
    %90 = vector.broadcast %cst_61 : f32 to vector<16x512xf32>
    %91 = arith.maximumf %89, %90 : vector<16x512xf32>
    %92 = vector.extract_strided_slice %91 {offsets = [0, 0], sizes = [16, 256], strides = [1, 1]} : vector<16x512xf32> to vector<16x256xf32>
    %c0_62 = arith.constant 0 : index
    %c0_63 = arith.constant 0 : index
    %c0_64 = arith.constant 0 : index
    %93 = vector.load %arg7[%c0_62, %c0_63, %c0_64] : memref<2x16x256xf32, #tpu.memory_space<vmem>>, vector<1x16x256xf32>
    %94 = vector.shape_cast %93 : vector<1x16x256xf32> to vector<16x256xf32>
    %95 = vector.shape_cast %92 : vector<16x256xf32> to vector<1x16x256xf32>
    tpu.vector_store %arg7[%c0_62, %c0_63, %c0_64], %95 {strides = array<i32>} : memref<2x16x256xf32, #tpu.memory_space<vmem>>, vector<1x16x256xf32>,
    %96 = vector.extract_strided_slice %91 {offsets = [0, 256], sizes = [16, 256], strides = [1, 1]} : vector<16x512xf32> to vector<16x256xf32>
    %c1_65 = arith.constant 1 : index
    %c0_66 = arith.constant 0 : index
    %c0_67 = arith.constant 0 : index
    %97 = vector.load %arg7[%c1_65, %c0_66, %c0_67] : memref<2x16x256xf32, #tpu.memory_space<vmem>>, vector<1x16x256xf32>
    %98 = vector.shape_cast %97 : vector<1x16x256xf32> to vector<16x256xf32>
    %99 = vector.shape_cast %96 : vector<16x256xf32> to vector<1x16x256xf32>
    tpu.vector_store %arg7[%c1_65, %c0_66, %c0_67], %99 {strides = array<i32>} : memref<2x16x256xf32, #tpu.memory_space<vmem>>, vector<1x16x256xf32>,
    return
  }
  func.func @transform_0(%arg0: i32) -> (i32, i32, i32) {
    %c0_i32 = arith.constant 0 : i32
    %c0_i32_0 = arith.constant 0 : i32
    %c0_i32_1 = arith.constant 0 : i32
    return %arg0, %c0_i32, %c0_i32_0 : i32, i32, i32
  }
  func.func @transform_1(%arg0: i32) -> (i32, i32) {
    %c0_i32 = arith.constant 0 : i32
    %c0_i32_0 = arith.constant 0 : i32
    %c0_i32_1 = arith.constant 0 : i32
    return %c0_i32, %c0_i32_0 : i32, i32
  }
  func.func @transform_2(%arg0: i32) -> (i32, i32, i32) {
    %c0_i32 = arith.constant 0 : i32
    %c0_i32_0 = arith.constant 0 : i32
    %c0_i32_1 = arith.constant 0 : i32
    %c0_i32_2 = arith.constant 0 : i32
    return %c0_i32, %c0_i32_0, %c0_i32_1 : i32, i32, i32
  }
  func.func @transform_3(%arg0: i32) -> (i32, i32) {
    %c0_i32 = arith.constant 0 : i32
    %c0_i32_0 = arith.constant 0 : i32
    %c0_i32_1 = arith.constant 0 : i32
    return %c0_i32, %c0_i32_0 : i32, i32
  }
  func.func @transform_4(%arg0: i32) -> (i32, i32) {
    %c0_i32 = arith.constant 0 : i32
    %c0_i32_0 = arith.constant 0 : i32
    %c0_i32_1 = arith.constant 0 : i32
    return %c0_i32, %c0_i32_0 : i32, i32
  }
  func.func @transform_5(%arg0: i32) -> (i32, i32) {
    %c0_i32 = arith.constant 0 : i32
    %c0_i32_0 = arith.constant 0 : i32
    %c0_i32_1 = arith.constant 0 : i32
    return %c0_i32, %c0_i32_0 : i32, i32
  }
  func.func @transform_6(%arg0: i32) -> (i32, i32, i32) {
    %c0_i32 = arith.constant 0 : i32
    %c0_i32_0 = arith.constant 0 : i32
    %c0_i32_1 = arith.constant 0 : i32
    return %arg0, %c0_i32, %c0_i32_0 : i32, i32, i32
  }
}

</mosaic_0001>

<bundles_post_ra>
// kernel: bottleneck_forward.1
= control target key start
LH: loop header
LB: loop body
LE: loop exit
PB: predicated region body
PF: predicated region fallthrough
CT: control target
= control target key end

     0   :  { %v1448_v3 = vmov 0   ;;  %vm42_vm0 = vcmask 130048   ;;  %vm137_vm1 = vcmask 1043456   ;;  %vm133_vm2 = vcmask 31744   ;;  %s1449_s9 = smov 17   ;;  %s1451_s10 = smov 15   ;;  %s1984_s0 = inlined_call_operand.vmem [shape: f32[2,16,256], index: 0, kind: input, shape index: {}]   ;;  %s1985_s1 = inlined_call_operand.vmem [shape: f32[4,16], index: 1, kind: input, shape index: {}]   ;;  %s1986_s4 = inlined_call_operand.vmem [shape: f32[32,1], index: 4, kind: input, shape index: {}]   ;;  %s1987_s2 = inlined_call_operand.vmem [shape: f32[9,4,4], index: 2, kind: input, shape index: {}]   ;;  %s1988_s5 = inlined_call_operand.vmem [shape: f32[9,512], index: 5, kind: input, shape index: {}]   ;;  %s1989_s3 = inlined_call_operand.vmem [shape: f32[16,4], index: 3, kind: input, shape index: {}]   ;;  %s1990_s6 = inlined_call_operand.vmem [shape: f32[2,16,256], index: 6, kind: output, shape index: {}]  }
   0x1   :  { %v1495_v0 = vld [vmem:[%s1984_s0 + $0x10] sm:$0xff]  ;;  %v1500_v1 = vld [vmem:[%s1984_s0 + $0x18] sm:$0xff]  ;;  %1445 = vset.pattern.permute.xlu0 %v1448_v3  ;;  %1446 = vset.pattern.permute.xlu2 %v1448_v3  ;;  %v1517_v5 = vld [vmem:[%s1984_s0] sm:$0xff]  ;;  %s1452_s11 = smov 1   ;;  %s1453_s12 = smov 127  }
   0x2   :  { %v1505_v2 = vld [vmem:[%s1984_s0 + $0x30] sm:$0xff]  ;;  %60 = vmatpush.msra.mxu0 %v1495_v0  ;;  %80 = vmatpush.msra.mxu1 %v1500_v1  ;;  %v1512_v4 = vld [vmem:[%s1984_s0 + $0x38] sm:$0xff]  ;;  %v1522_v6 = vld [vmem:[%s1984_s0 + $0x8] sm:$0xff]  ;;  %s1454_s13 = smov 113   ;;  %s1455_s14 = smov 112  }
   0x3   :  { %100 = vmatpush.msra.mxu2 %v1505_v2  ;;  %120 = vmatpush.msra.mxu3 %v1512_v4  ;;  %v1529_v7 = vld [vmem:[%s1984_s0 + $0x20] sm:$0xff]  ;;  %v1534_v8 = vld [vmem:[%s1984_s0 + $0x28] sm:$0xff]  ;;  %v1333_v25 = vld [vmem:[%s1987_s2 + $0x10] sm:$0xf]  ;;  %s1456_s15 = smov 111  }
   0x4   :  { %v36_v9 = vld [vmem:[%s1985_s1] sm:$0xf]  ;;  %61 = vmatpush.msra.mxu0 %v1517_v5  ;;  %81 = vmatpush.msra.mxu1 %v1522_v6  ;;  %v1350_v26 = vld [vmem:[%s1987_s2 + $0x4] sm:$0xf]  ;;  %v1360_v27 = vld [vmem:[%s1987_s2 + $0x8] sm:$0xf] }
   0x5   :  { %101 = vmatpush.msra.mxu2 %v1529_v7  ;;  %121 = vmatpush.msra.mxu3 %v1534_v8  ;;  %v32_v10 = vld [vmem:[%s1986_s4] sm:$0xf]  ;;  %v1370_v28 = vld [vmem:[%s1987_s2 + $0xc] sm:$0xf]  ;;  %v1380_v29 = vld [vmem:[%s1987_s2 + $0x14] sm:$0xf] }
   0x6   :  { %1329 = vmatmul.msk.f32.vlgmr.msra.gmra.mxu0 %vm42_vm0, %v36_v9  ;;  %1330 = vmatmul.msk.f32.vlgmr.msra.gmra.mxu1 %vm42_vm0, %v36_v9  ;;  %v132_v18 = vld [vmem:[%s1987_s2] sm:$0xf]  ;;  %v1390_v30 = vld [vmem:[%s1987_s2 + $0x18] sm:$0xf]  ;;  %v1400_v31 = vld [vmem:[%s1987_s2 + $0x1c] sm:$0xf] }
   0x7   :  { %1331 = vmatmul.msk.f32.vlgmr.msra.gmra.mxu2 %vm42_vm0, %v36_v9  ;;  %1332 = vmatmul.msk.f32.vlgmr.msra.gmra.mxu3 %vm42_vm0, %v36_v9  ;;  %v1410_v32 = vld [vmem:[%s1987_s2 + $0x20] sm:$0xf]  ;;  %s1450_s2 = smov 16  }
   0x8   :  { %39 = vperm.xlu0 %1445, %v32_v10   ;;  %1447 = vset.pattern.permute.xlu1 %v1448_v3 }
  0x7a   :  { %v40_v11 = vpop.permute.xlu0 %39 }
  0x83   :  { %v63_v12 = vpop.f32.mrf.mxu0  ;;  %v83_v13 = vpop.f32.mrf.mxu1 }
  0x84   :  { %v64_v14 = vadd.f32 %v63_v12, %v40_v11  ;;  %v84_v15 = vadd.f32 %v83_v13, %v40_v11  ;;  %v33_v13 = vld [vmem:[%s1986_s4 + $0x8] sm:$0xf] }
  0x86   :  { %v1546_v16 = vmax.f32 %v64_v14, 0.0  ;;  %v1548_v17 = vmax.f32 %v84_v15, 0.0  ;;  %v35_v14 = vld [vmem:[%s1986_s4 + $0x18] sm:$0xff]  ;;  %v238_v15 = vlaneseq }
  0x88   :  { %1334 = vmatpush.msk.msrb.mxu0 %vm137_vm1, %v1546_v16  ;;  %1336 = vmatpush.msk.msrb.mxu1 %vm137_vm1, %v1548_v17 }
  0x89   :  { %1335 = vmatmul.msk.f32.vlgmr.msrb.gmra.mxu0 %vm133_vm2, %v132_v18  ;;  %1337 = vmatmul.msk.f32.vlgmr.msrb.gmra.mxu1 %vm133_vm2, %v132_v18 }
  0x8a   :  { %v103_v19 = vpop.f32.mrf.mxu2  ;;  %v123_v20 = vpop.f32.mrf.mxu3  ;;  %1342 = vmatpush.msk.msra.mxu0 %vm137_vm1, %v1546_v16  ;;  %1344 = vmatpush.msk.msra.mxu1 %vm137_vm1, %v1548_v17 }
  0x8b   :  { %v104_v21 = vadd.f32 %v103_v19, %v40_v11  ;;  %v124_v22 = vadd.f32 %v123_v20, %v40_v11  ;;  %v1693_v19 = vld [vmem:[%s1988_s5 + $0x1] ss:$8 sm:$0xf] }
  0x8c   :  { %1351 = vmatpush.msk.msrb.mxu0 %vm137_vm1, %v1546_v16  ;;  %1353 = vmatpush.msk.msrb.mxu1 %vm137_vm1, %v1548_v17 }
  0x8d   :  { %v128_v23 = vmax.f32 %v104_v21, 0.0  ;;  %v129_v24 = vmax.f32 %v124_v22, 0.0 }
  0x8f   :  { %1338 = vmatpush.msk.msrb.mxu2 %vm137_vm1, %v128_v23  ;;  %1340 = vmatpush.msk.msrb.mxu3 %vm137_vm1, %v129_v24 }
  0x90   :  { %1339 = vmatmul.msk.f32.vlgmr.msrb.gmra.mxu2 %vm133_vm2, %v132_v18  ;;  %1341 = vmatmul.msk.f32.vlgmr.msrb.gmra.mxu3 %vm133_vm2, %v132_v18  ;;  %v1688_v18 = vld [vmem:[%s1988_s5] ss:$8 sm:$0xf] }
  0x91   :  { %1346 = vmatpush.msk.msra.mxu2 %vm137_vm1, %v128_v23  ;;  %1348 = vmatpush.msk.msra.mxu3 %vm137_vm1, %v129_v24  ;;  %v248_v20 = vperm.slane %v1688_v18, 1 }
  0x92   :  { %1343 = vmatmul.msk.f32.vlgmr.msra.gmra.mxu0 %vm133_vm2, %v1333_v25  ;;  %1345 = vmatmul.msk.f32.vlgmr.msra.gmra.mxu1 %vm133_vm2, %v1333_v25 }
  0x93   :  { %1355 = vmatpush.msk.msrb.mxu2 %vm137_vm1, %v128_v23  ;;  %1357 = vmatpush.msk.msrb.mxu3 %vm137_vm1, %v129_v24 }
  0x94   :  { %1361 = vmatpush.msk.msra.mxu0 %vm137_vm1, %v1546_v16  ;;  %1363 = vmatpush.msk.msra.mxu1 %vm137_vm1, %v1548_v17 }
  0x98   :  { %1347 = vmatmul.msk.f32.vlgmr.msra.gmra.mxu2 %vm133_vm2, %v1333_v25  ;;  %1349 = vmatmul.msk.f32.vlgmr.msra.gmra.mxu3 %vm133_vm2, %v1333_v25 }
  0x99   :  { %1365 = vmatpush.msk.msra.mxu2 %vm137_vm1, %v128_v23  ;;  %1367 = vmatpush.msk.msra.mxu3 %vm137_vm1, %v129_v24 }
  0x9a   :  { %1352 = vmatmul.msk.f32.vlgmr.msrb.gmra.mxu0 %vm133_vm2, %v1350_v26  ;;  %1354 = vmatmul.msk.f32.vlgmr.msrb.gmra.mxu1 %vm133_vm2, %v1350_v26 }
  0x9b   :  { %1371 = vmatpush.msk.msrb.mxu0 %vm137_vm1, %v1546_v16  ;;  %1373 = vmatpush.msk.msrb.mxu1 %vm137_vm1, %v1548_v17 }
  0xa0   :  { %1356 = vmatmul.msk.f32.vlgmr.msrb.gmra.mxu2 %vm133_vm2, %v1350_v26  ;;  %1358 = vmatmul.msk.f32.vlgmr.msrb.gmra.mxu3 %vm133_vm2, %v1350_v26 }
  0xa1   :  { %1375 = vmatpush.msk.msrb.mxu2 %vm137_vm1, %v128_v23  ;;  %1377 = vmatpush.msk.msrb.mxu3 %vm137_vm1, %v129_v24 }
  0xa2   :  { %1362 = vmatmul.msk.f32.vlgmr.msra.gmra.mxu0 %vm133_vm2, %v1360_v27  ;;  %1364 = vmatmul.msk.f32.vlgmr.msra.gmra.mxu1 %vm133_vm2, %v1360_v27 }
  0xa3   :  { %1381 = vmatpush.msk.msra.mxu0 %vm137_vm1, %v1546_v16  ;;  %1383 = vmatpush.msk.msra.mxu1 %vm137_vm1, %v1548_v17 }
  0xa8   :  { %1366 = vmatmul.msk.f32.vlgmr.msra.gmra.mxu2 %vm133_vm2, %v1360_v27  ;;  %1368 = vmatmul.msk.f32.vlgmr.msra.gmra.mxu3 %vm133_vm2, %v1360_v27 }
  0xa9   :  { %1385 = vmatpush.msk.msra.mxu2 %vm137_vm1, %v128_v23  ;;  %1387 = vmatpush.msk.msra.mxu3 %vm137_vm1, %v129_v24 }
  0xaa   :  { %1372 = vmatmul.msk.f32.vlgmr.msrb.gmra.mxu0 %vm133_vm2, %v1370_v28  ;;  %1374 = vmatmul.msk.f32.vlgmr.msrb.gmra.mxu1 %vm133_vm2, %v1370_v28 }
  0xab   :  { %1391 = vmatpush.msk.msrb.mxu0 %vm137_vm1, %v1546_v16  ;;  %1393 = vmatpush.msk.msrb.mxu1 %vm137_vm1, %v1548_v17 }
  0xb0   :  { %1376 = vmatmul.msk.f32.vlgmr.msrb.gmra.mxu2 %vm133_vm2, %v1370_v28  ;;  %1378 = vmatmul.msk.f32.vlgmr.msrb.gmra.mxu3 %vm133_vm2, %v1370_v28 }
  0xb1   :  { %1395 = vmatpush.msk.msrb.mxu2 %vm137_vm1, %v128_v23  ;;  %1397 = vmatpush.msk.msrb.mxu3 %vm137_vm1, %v129_v24 }
  0xb2   :  { %1382 = vmatmul.msk.f32.vlgmr.msra.gmra.mxu0 %vm133_vm2, %v1380_v29  ;;  %1384 = vmatmul.msk.f32.vlgmr.msra.gmra.mxu1 %vm133_vm2, %v1380_v29 }
  0xb3   :  { %1401 = vmatpush.msk.msra.mxu0 %vm137_vm1, %v1546_v16  ;;  %1403 = vmatpush.msk.msra.mxu1 %vm137_vm1, %v1548_v17 }
  0xb8   :  { %1386 = vmatmul.msk.f32.vlgmr.msra.gmra.mxu2 %vm133_vm2, %v1380_v29  ;;  %1388 = vmatmul.msk.f32.vlgmr.msra.gmra.mxu3 %vm133_vm2, %v1380_v29 }
  0xb9   :  { %1405 = vmatpush.msk.msra.mxu2 %vm137_vm1, %v128_v23  ;;  %1407 = vmatpush.msk.msra.mxu3 %vm137_vm1, %v129_v24 }
  0xba   :  { %1392 = vmatmul.msk.f32.vlgmr.msrb.gmra.mxu0 %vm133_vm2, %v1390_v30  ;;  %1394 = vmatmul.msk.f32.vlgmr.msrb.gmra.mxu1 %vm133_vm2, %v1390_v30 }
  0xbb   :  { %1411 = vmatpush.msk.msrb.mxu0 %vm137_vm1, %v1546_v16  ;;  %1413 = vmatpush.msk.msrb.mxu1 %vm137_vm1, %v1548_v17  ;;  %v1683_v17 = vand.u32 127, %v238_v15 }
  0xbd   :  { %vm240_vm3 = vcmp.lt.s32.totalorder %v1683_v17, 17  ;;  %vm435_vm4 = vcmp.lt.s32.totalorder %v1683_v17, 16  ;;  %vm552_vm5 = vcmp.lt.s32.totalorder %v1683_v17, 15  ;;  %vm669_vm6 = vcmp.lt.s32.totalorder %v1683_v17, 1 }
  0xbe   :  { %vm786_vm7 = vcmp.lt.s32.totalorder %v1683_v17, 127  ;;  %vm903_vm8 = vcmp.lt.s32.totalorder %v1683_v17, 113  ;;  %vm1020_vm9 = vcmp.lt.s32.totalorder %v1683_v17, 112  ;;  %vm1137_vm10 = vcmp.lt.s32.totalorder %v1683_v17, 111 }
  0xc0   :  { %1396 = vmatmul.msk.f32.vlgmr.msrb.gmra.mxu2 %vm133_vm2, %v1390_v30  ;;  %1398 = vmatmul.msk.f32.vlgmr.msrb.gmra.mxu3 %vm133_vm2, %v1390_v30 }
  0xc1   :  { %1415 = vmatpush.msk.msrb.mxu2 %vm137_vm1, %v128_v23  ;;  %1417 = vmatpush.msk.msrb.mxu3 %vm137_vm1, %v129_v24  ;;  %v444_v23 = vperm.slane %v1693_v19, 1 }
  0xc2   :  { %1402 = vmatmul.msk.f32.vlgmr.msra.gmra.mxu0 %vm133_vm2, %v1400_v31  ;;  %1404 = vmatmul.msk.f32.vlgmr.msra.gmra.mxu1 %vm133_vm2, %v1400_v31 }
  0xc8   :  { %1406 = vmatmul.msk.f32.vlgmr.msra.gmra.mxu2 %vm133_vm2, %v1400_v31  ;;  %1408 = vmatmul.msk.f32.vlgmr.msra.gmra.mxu3 %vm133_vm2, %v1400_v31 }
  0xca   :  { %1412 = vmatmul.msk.f32.vlgmr.msrb.gmra.mxu0 %vm133_vm2, %v1410_v32  ;;  %1414 = vmatmul.msk.f32.vlgmr.msrb.gmra.mxu1 %vm133_vm2, %v1410_v32 }
  0xd0   :  { %1416 = vmatmul.msk.f32.vlgmr.msrb.gmra.mxu2 %vm133_vm2, %v1410_v32  ;;  %1418 = vmatmul.msk.f32.vlgmr.msrb.gmra.mxu3 %vm133_vm2, %v1410_v32 }
 0x106   :  { %v167_v33 = vpop.f32.mrf.mxu0  ;;  %v187_v34 = vpop.f32.mrf.mxu1 }
 0x107   :  { %232 = vrot.lane.b32.xlu0 %v187_v34, %s1449_s9  ;;  %230 = vrot.lane.b32.xlu1 %v167_v33, %s1449_s9 }
 0x10f   :  { %v1667_v35 = vpop.f32.mrf.mxu0  ;;  %v1669_v36 = vpop.f32.mrf.mxu1 }
 0x113   :  { %v207_v37 = vpop.f32.mrf.mxu2  ;;  %v227_v38 = vpop.f32.mrf.mxu3 }
 0x114   :  { %234 = vrot.lane.b32.xlu1 %v207_v37, %s1449_s9 }
 0x117   :  { %v364_v39 = vpop.f32.mrf.mxu0  ;;  %v384_v40 = vpop.f32.mrf.mxu1 }
 0x118   :  { %429 = vrot.lane.b32.xlu2 %v384_v40, %s1450_s2 }
 0x11b   :  { %v1671_v41 = vpop.f32.mrf.mxu2  ;;  %v1673_v42 = vpop.f32.mrf.mxu3 }
 0x11c   :  { %236 = vrot.lane.b32.xlu1 %v227_v38, %s1449_s9 }
 0x11f   :  { %v481_v43 = vpop.f32.mrf.mxu0  ;;  %v501_v44 = vpop.f32.mrf.mxu1 }
 0x120   :  { %427 = vrot.lane.b32.xlu2 %v364_v39, %s1450_s2  ;;  %544 = vrot.lane.b32.xlu0 %v481_v43, %s1451_s10  ;;  %v247_v39 = vperm.slane %v1688_v18, 0 }
 0x123   :  { %v404_v45 = vpop.f32.mrf.mxu2  ;;  %v424_v46 = vpop.f32.mrf.mxu3 }
 0x124   :  { %546 = vrot.lane.b32.xlu1 %v501_v44, %s1451_s10  ;;  %v443_v44 = vperm.slane %v1693_v19, 0 }
 0x127   :  { %v598_v47 = vpop.f32.mrf.mxu0  ;;  %v618_v50 = vpop.f32.mrf.mxu1 }
 0x128   :  { %431 = vrot.lane.b32.xlu2 %v404_v45, %s1450_s2  ;;  %433 = vrot.lane.b32.xlu0 %v424_v46, %s1450_s2 }
 0x12b   :  { %v521_v48 = vpop.f32.mrf.mxu2  ;;  %v541_v49 = vpop.f32.mrf.mxu3 }
 0x12c   :  { %661 = vrot.lane.b32.xlu1 %v598_v47, %s1452_s11 }
 0x12f   :  { %v715_v51 = vpop.f32.mrf.mxu0  ;;  %v735_v57 = vpop.f32.mrf.mxu1 }
 0x130   :  { %663 = vrot.lane.b32.xlu2 %v618_v50, %s1452_s11  ;;  %550 = vrot.lane.b32.xlu0 %v541_v49, %s1451_s10 }
 0x133   :  { %v638_v52 = vpop.f32.mrf.mxu2  ;;  %v658_v53 = vpop.f32.mrf.mxu3 }
 0x134   :  { %667 = vrot.lane.b32.xlu1 %v658_v53, %s1452_s11 }
 0x137   :  { %v832_v54 = vpop.f32.mrf.mxu0  ;;  %v852_v60 = vpop.f32.mrf.mxu1 }
 0x138   :  { %548 = vrot.lane.b32.xlu2 %v521_v48, %s1451_s10  ;;  %778 = vrot.lane.b32.xlu0 %v715_v51, %s1453_s12 }
 0x13b   :  { %v755_v55 = vpop.f32.mrf.mxu2  ;;  %v775_v56 = vpop.f32.mrf.mxu3 }
 0x13c   :  { %895 = vrot.lane.b32.xlu1 %v832_v54, %s1454_s13 }
 0x13f   :  { %v949_v63 = vpop.f32.mrf.mxu0  ;;  %v969_v10 = vpop.f32.mrf.mxu1 }
 0x140   :  { %780 = vrot.lane.b32.xlu2 %v735_v57, %s1453_s12  ;;  %665 = vrot.lane.b32.xlu0 %v638_v52, %s1452_s11 }
 0x143   :  { %v872_v58 = vpop.f32.mrf.mxu2  ;;  %v892_v59 = vpop.f32.mrf.mxu3 }
 0x144   :  { %782 = vrot.lane.b32.xlu1 %v755_v55, %s1453_s12 }
 0x147   :  { %v1066_v9 = vpop.f32.mrf.mxu0  ;;  %v1086_v12 = vpop.f32.mrf.mxu1 }
 0x148   :  { %784 = vrot.lane.b32.xlu2 %v775_v56, %s1453_s12  ;;  %897 = vrot.lane.b32.xlu0 %v852_v60, %s1454_s13 }
 0x14b   :  { %v989_v61 = vpop.f32.mrf.mxu2  ;;  %v1009_v62 = vpop.f32.mrf.mxu3 }
 0x14c   :  { %1018 = vrot.lane.b32.xlu1 %v1009_v62, %s1455_s14  ;;  %v1753_v62 = vld [vmem:[%s1988_s5 + $0x2] ss:$8 sm:$0xf] }
 0x150   :  { %901 = vrot.lane.b32.xlu0 %v892_v59, %s1454_s13  ;;  %1012 = vrot.lane.b32.xlu2 %v949_v63, %s1455_s14 }
 0x153   :  { %v1106_v3 = vpop.f32.mrf.mxu2  ;;  %v1126_v11 = vpop.f32.mrf.mxu3 }
 0x154   :  { %1133 = vrot.lane.b32.xlu1 %v1106_v3, %s1456_s15 }
 0x158   :  { %899 = vrot.lane.b32.xlu2 %v872_v58, %s1454_s13  ;;  %1129 = vrot.lane.b32.xlu0 %v1066_v9, %s1456_s15  ;;  %v250_v58 = vperm.slane %v1688_v18, 3  ;;  %v563_v9 = vperm.slane %v1753_v62, 3 }
 0x15c   :  { %1014 = vrot.lane.b32.xlu1 %v969_v10, %s1455_s14  ;;  %v1763_v10 = vld [vmem:[%s1988_s5 + $0x3] ss:$8 sm:$0xf] }
 0x160   :  { %1016 = vrot.lane.b32.xlu0 %v989_v61, %s1455_s14  ;;  %1135 = vrot.lane.b32.xlu2 %v1126_v11, %s1456_s15  ;;  %v446_v61 = vperm.slane %v1693_v19, 3 }
 0x168   :  { %1131 = vrot.lane.b32.xlu0 %v1086_v12, %s1456_s15  ;;  %1163 = vperm.xlu2 %1446, %v33_v13   ;;  %v680_v13 = vperm.slane %v1763_v10, 3 }
 0x170   :  { %1183 = vperm.xlu2 %1446, %v35_v14  }
 0x172   :  { %v1681_v16 = vpop.permute.xlu2 %429 }
 0x179   :  { %v233_v21 = vpop.permute.xlu0 %232  ;;  %v231_v22 = vpop.permute.xlu1 %230 }
 0x17a   :  { %v243_v24 = vsel %vm240_vm3, %v231_v22, %v233_v21  ;;  %v428_v26 = vpop.permute.xlu2 %427 }
 0x17b   :  { %v256_v25 = vmul.f32 %v248_v20, %v243_v24  ;;  %v438_v27 = vsel %vm435_vm4, %v428_v26, %v1681_v16  ;;  %v249_v24 = vperm.slane %v1688_v18, 2 }
 0x17c   :  { %v452_v29 = vmul.f32 %v444_v23, %v438_v27 }
 0x17d   :  { %v300_v28 = vadd.f32 %v1669_v36, %v256_v25  ;;  %v1784_v25 = vld [vmem:[%s1988_s5 + $0x5] ss:$8 sm:$0xf] }
 0x17f   :  { %v1705_v30 = vadd.f32 %v452_v29, %v300_v28 }
 0x182   :  { %v1707_v31 = vpop.permute.xlu2 %431 }
 0x186   :  { %v235_v32 = vpop.permute.xlu1 %234 }
 0x187   :  { %v242_v27 = vsel %vm240_vm3, %v233_v21, %v235_v32 }
 0x18a   :  { %v1709_v33 = vpop.permute.xlu2 %663 }
 0x18e   :  { %v237_v34 = vpop.permute.xlu1 %236 }
 0x18f   :  { %v244_v40 = vsel %vm240_vm3, %v237_v34, %v231_v22  ;;  %v241_v59 = vsel %vm240_vm3, %v235_v32, %v237_v34  ;;  %v797_v34 = vperm.slane %v1784_v25, 3 }
 0x190   :  { %v255_v36 = vmul.f32 %v247_v39, %v244_v40  ;;  %v258_v3 = vmul.f32 %v250_v58, %v241_v59  ;;  %v257_v40 = vmul.f32 %v249_v24, %v242_v27 }
 0x192   :  { %v1711_v37 = vpop.permute.xlu0 %544  ;;  %v1713_v38 = vpop.permute.xlu2 %548  ;;  %v280_v47 = vadd.f32 %v1667_v35, %v255_v36  ;;  %v340_v22 = vadd.f32 %v1673_v42, %v258_v3  ;;  %v1794_v42 = vld [vmem:[%s1988_s5 + $0x6] ss:$8 sm:$0xf]  ;;  %v320_v59 = vadd.f32 %v1671_v41, %v257_v40  ;;  %v678_v3 = vperm.slane %v1763_v10, 1 }
 0x193   :  { %v914_v39 = vperm.slane %v1794_v42, 3 }
 0x196   :  { %v1718_v43 = vpop.permute.xlu1 %546 }
 0x197   :  { %v555_v41 = vsel %vm552_vm5, %v1711_v37, %v1718_v43 }
 0x19a   :  { %v434_v45 = vpop.permute.xlu0 %433  ;;  %v1724_v49 = vpop.permute.xlu2 %780 }
 0x19b   :  { %v439_v46 = vsel %vm435_vm4, %v434_v45, %v428_v26  ;;  %v436_v63 = vsel %vm435_vm4, %v1707_v31, %v434_v45  ;;  %v1807_v45 = vld [vmem:[%s1988_s5 + $0x7] ss:$8 sm:$0xf] }
 0x19c   :  { %v451_v48 = vmul.f32 %v443_v44, %v439_v46  ;;  %v454_v12 = vmul.f32 %v446_v61, %v436_v63  ;;  %v445_v44 = vperm.slane %v1693_v19, 2  ;;  %v561_v61 = vperm.slane %v1753_v62, 1 }
 0x19d   :  { %v562_v63 = vperm.slane %v1753_v62, 2 }
 0x19e   :  { %v1726_v50 = vpop.permute.xlu1 %661  ;;  %v1728_v51 = vadd.f32 %v451_v48, %v280_v47  ;;  %v458_v28 = vadd.f32 %v454_v12, %v340_v22  ;;  %v437_v48 = vsel %vm435_vm4, %v1681_v16, %v1707_v31  ;;  %v554_v16 = vsel %vm552_vm5, %v1718_v43, %v1713_v38 }
 0x19f   :  { %v1031_v31 = vperm.slane %v1807_v45, 3  ;;  %v453_v12 = vmul.f32 %v445_v44, %v437_v48  ;;  %v569_v27 = vmul.f32 %v561_v61, %v555_v41  ;;  %v913_v44 = vperm.slane %v1794_v42, 2 }
 0x1a0   :  { %v911_v41 = vperm.slane %v1794_v42, 0 }
 0x1a2   :  { %v1730_v52 = vpop.permute.xlu0 %550  ;;  %v1734_v54 = vpop.permute.xlu2 %784 }
 0x1a3   :  { %v553_v11 = vsel %vm552_vm5, %v1713_v38, %v1730_v52  ;;  %v679_v38 = vperm.slane %v1763_v10, 2 }
 0x1a4   :  { %v571_v23 = vmul.f32 %v563_v9, %v553_v11  ;;  %v1826_v9 = vld [vmem:[%s1988_s5 + $0x20] ss:$8 sm:$0xf] }
 0x1a5   :  { %v1148_v43 = vperm.slane %v1826_v9, 3 }
 0x1a6   :  { %v1732_v53 = vpop.permute.xlu1 %667  ;;  %v575_v18 = vadd.f32 %v571_v23, %v458_v28  ;;  %v570_v28 = vmul.f32 %v562_v63, %v554_v16 }
 0x1a7   :  { %v673_v61 = vsel %vm669_vm6, %v1732_v53, %v1726_v50 }
 0x1aa   :  { %v1736_v55 = vpop.permute.xlu0 %778  ;;  %v1740_v57 = vpop.permute.xlu2 %1012 }
 0x1ab   :  { %v790_v21 = vsel %vm786_vm7, %v1734_v54, %v1736_v55 }
 0x1ac   :  { %v805_v58 = vmul.f32 %v797_v34, %v790_v21  ;;  %v796_v34 = vperm.slane %v1784_v25, 2  ;;  %v672_v21 = vsel %vm669_vm6, %v1726_v50, %v1709_v33 }
 0x1ae   :  { %v1738_v56 = vpop.permute.xlu1 %895 }
 0x1b2   :  { %v1742_v35 = vpop.permute.xlu0 %665  ;;  %v1777_v20 = vpop.permute.xlu2 %899 }
 0x1b3   :  { %v670_v15 = vsel %vm669_vm6, %v1742_v35, %v1732_v53 }
 0x1b4   :  { %v688_v29 = vmul.f32 %v680_v13, %v670_v15  ;;  %v560_v13 = vperm.slane %v1753_v62, 0  ;;  %v677_v15 = vperm.slane %v1763_v10, 0  ;;  %v794_v62 = vperm.slane %v1784_v25, 0 }
 0x1b5   :  { %v556_v10 = vsel %vm552_vm5, %v1730_v52, %v1711_v37 }
 0x1b6   :  { %v1747_v60 = vpop.permute.xlu1 %782  ;;  %v692_v32 = vadd.f32 %v688_v29, %v575_v18  ;;  %v671_v29 = vsel %vm669_vm6, %v1709_v33, %v1742_v35  ;;  %v457_v18 = vadd.f32 %v453_v12, %v320_v59 }
 0x1b7   :  { %v787_v35 = vsel %vm786_vm7, %v1747_v60, %v1734_v54  ;;  %v687_v52 = vmul.f32 %v679_v38, %v671_v29  ;;  %v34_v54 = vld [vmem:[%s1986_s4 + $0x10] sm:$0xff]  ;;  %v788_v50 = vsel %vm786_vm7, %v1724_v49, %v1747_v60  ;;  %v1174_v60 = vld [vmem:[%s1989_s3] sm:$0xff] }
 0x1b8   :  { %v809_v11 = vadd.f32 %v805_v58, %v692_v32  ;;  %v795_v32 = vperm.slane %v1784_v25, 1  ;;  %v573_v58 = vadd.f32 %v569_v27, %v1705_v30  ;;  %v574_v33 = vadd.f32 %v570_v28, %v457_v18  ;;  %1178 = vperm.xlu1 %1447, %v34_v54  }
 0x1b9   :  { %v789_v30 = vsel %vm786_vm7, %v1736_v55, %v1724_v49  ;;  %v804_v63 = vmul.f32 %v796_v34, %v787_v35  ;;  %v1028_v27 = vperm.slane %v1807_v45, 0 }
 0x1ba   :  { %v1771_v14 = vpop.permute.xlu0 %897  ;;  %v1812_v47 = vpop.permute.xlu2 %1135  ;;  %v691_v12 = vadd.f32 %v687_v52, %v574_v33  ;;  %v802_v38 = vmul.f32 %v794_v62, %v789_v30 }
 0x1be   :  { %v1786_v26 = vpop.permute.xlu1 %1018 }
 0x1bf   :  { %v1024_v22 = vsel %vm1020_vm9, %v1786_v26, %v1740_v57 }
 0x1c2   :  { %v902_v36 = vpop.permute.xlu0 %901  ;;  %v1878_v59 = vpop.permute.xlu2 %1163 }
 0x1c3   :  { %v907_v46 = vsel %vm903_vm8, %v902_v36, %v1738_v56  ;;  %v904_v25 = vsel %vm903_vm8, %v1777_v20, %v902_v36  ;;  %v686_v36 = vmul.f32 %v678_v3, %v672_v21  ;;  %v1147_v3 = vperm.slane %v1826_v9, 2 }
 0x1c4   :  { %v922_v19 = vmul.f32 %v914_v39, %v907_v46  ;;  %v1039_v39 = vmul.f32 %v1031_v31, %v1024_v22  ;;  %v912_v31 = vperm.slane %v1794_v42, 1  ;;  %v921_v53 = vmul.f32 %v913_v44, %v904_v25  ;;  %v1175_v25 = vld [vmem:[%s1989_s3 + $0x8] sm:$0xff] }
 0x1c5   :  { %v685_v22 = vmul.f32 %v677_v15, %v673_v61  ;;  %v906_v42 = vsel %vm903_vm8, %v1738_v56, %v1771_v14  ;;  %v905_v15 = vsel %vm903_vm8, %v1771_v14, %v1777_v20  ;;  %v690_v14 = vadd.f32 %v686_v36, %v573_v58 }
 0x1c6   :  { %v1843_v23 = vpop.permute.xlu1 %1133  ;;  %v926_v24 = vadd.f32 %v922_v19, %v809_v11  ;;  %v568_v19 = vmul.f32 %v560_v13, %v556_v10  ;;  %v1030_v11 = vperm.slane %v1807_v45, 2  ;;  %v1029_v10 = vperm.slane %v1807_v45, 1 }
 0x1c7   :  { %v1138_v62 = vsel %vm1137_vm10, %v1843_v23, %v1812_v47  ;;  %v920_v21 = vmul.f32 %v912_v31, %v905_v15  ;;  %v1145_v45 = vperm.slane %v1826_v9, 0 }
 0x1c8   :  { %v1043_v46 = vadd.f32 %v1039_v39, %v926_v24  ;;  %v572_v55 = vadd.f32 %v568_v19, %v1728_v51  ;;  %v803_v51 = vmul.f32 %v795_v32, %v788_v50  ;;  %v919_v39 = vmul.f32 %v911_v41, %v906_v42 }
 0x1ca   :  { %v1858_v40 = vpop.permute.xlu0 %1129  ;;  %v689_v20 = vadd.f32 %v685_v22, %v572_v55  ;;  %v1184_v55 = vpop.permute.xlu2 %1183 }
 0x1cb   :  { %v1141_v37 = vsel %vm1137_vm10, %v1812_v47, %v1858_v40 }
 0x1cc   :  { %v1156_v48 = vmul.f32 %v1148_v43, %v1141_v37  ;;  %v808_v43 = vadd.f32 %v804_v63, %v691_v12  ;;  %v806_v35 = vadd.f32 %v802_v38, %v689_v20  ;;  %v807_v37 = vadd.f32 %v803_v51, %v690_v14 }
 0x1ce   :  { %v1160_v16 = vadd.f32 %v1156_v48, %v1043_v46  ;;  %v1015_v24 = vpop.permute.xlu1 %1014  ;;  %v925_v29 = vadd.f32 %v921_v53, %v808_v43  ;;  %v1146_v46 = vperm.slane %v1826_v9, 1  ;;  %v923_v48 = vadd.f32 %v919_v39, %v806_v35 }
 0x1cf   :  { %v1023_v18 = vsel %vm1020_vm9, %v1740_v57, %v1015_v24  ;;  %v924_v58 = vadd.f32 %v920_v21, %v807_v37 }
 0x1d0   :  { %v1169_v13 = vadd.f32 %v1878_v59, %v1160_v16  ;;  %v1036_v52 = vmul.f32 %v1028_v27, %v1023_v18 }
 0x1d2   :  { %v1173_v28 = vmax.f32 %v1169_v13, 0.0  ;;  %v1017_v49 = vpop.permute.xlu0 %1016  ;;  %v1040_v54 = vadd.f32 %v1036_v52, %v923_v48 }
 0x1d3   :  { %v1021_v56 = vsel %vm1020_vm9, %v1017_v49, %v1786_v26  ;;  %v1022_v47 = vsel %vm1020_vm9, %v1015_v24, %v1017_v49  ;;  %v1155_v26 = vmul.f32 %v1147_v3, %v1138_v62 }
 0x1d4   :  { %v1038_v34 = vmul.f32 %v1030_v11, %v1021_v56  ;;  %1429 = vmatpush.msk.msra.mxu3 %vm137_vm1, %v1173_v28  ;;  %v1037_v57 = vmul.f32 %v1029_v10, %v1022_v47 }
 0x1d5   :  { %1430 = vmatmul.msk.f32.vlgmr.msra.gmra.mxu3 %vm133_vm2, %v1174_v60 }
 0x1d6   :  { %v1042_v32 = vadd.f32 %v1038_v34, %v925_v29  ;;  %v1041_v63 = vadd.f32 %v1037_v57, %v924_v58 }
 0x1d8   :  { %v1159_v44 = vadd.f32 %v1155_v26, %v1042_v32 }
 0x1da   :  { %v1168_v33 = vadd.f32 %v1878_v59, %v1159_v44  ;;  %v1132_v19 = vpop.permute.xlu0 %1131 }
 0x1db   :  { %v1139_v61 = vsel %vm1137_vm10, %v1132_v19, %v1843_v23  ;;  %v1140_v30 = vsel %vm1137_vm10, %v1858_v40, %v1132_v19 }
 0x1dc   :  { %v1172_v9 = vmax.f32 %v1168_v33, 0.0  ;;  %v1153_v16 = vmul.f32 %v1145_v45, %v1140_v30  ;;  %v1154_v36 = vmul.f32 %v1146_v46, %v1139_v61 }
 0x1dd   :  { %1431 = vmatmul.msk.f32.gmra.mxu3 %vm133_vm2, %v1175_v25 }
 0x1de   :  { %v1157_v41 = vadd.f32 %v1153_v16, %v1040_v54  ;;  %v1158_v31 = vadd.f32 %v1154_v36, %v1041_v63  ;;  %1426 = vmatpush.msk.msra.mxu2 %vm137_vm1, %v1172_v9 }
 0x1df   :  { %1427 = vmatmul.msk.f32.vlgmr.msra.gmra.mxu2 %vm133_vm2, %v1174_v60 }
 0x1e0   :  { %v1166_v11 = vadd.f32 %v1878_v59, %v1157_v41  ;;  %v1167_v23 = vadd.f32 %v1878_v59, %v1158_v31 }
 0x1e2   :  { %v1170_v12 = vmax.f32 %v1166_v11, 0.0  ;;  %v1171_v50 = vmax.f32 %v1167_v23, 0.0 }
 0x1e4   :  { %1420 = vmatpush.msk.msra.mxu0 %vm137_vm1, %v1170_v12  ;;  %1423 = vmatpush.msk.msra.mxu1 %vm137_vm1, %v1171_v50 }
 0x1e5   :  { %1421 = vmatmul.msk.f32.vlgmr.msra.gmra.mxu0 %vm133_vm2, %v1174_v60  ;;  %1424 = vmatmul.msk.f32.vlgmr.msra.gmra.mxu1 %vm133_vm2, %v1174_v60 }
 0x1e7   :  { %1428 = vmatmul.msk.f32.gmra.mxu2 %vm133_vm2, %v1175_v25 }
 0x1ed   :  { %1422 = vmatmul.msk.f32.gmra.mxu0 %vm133_vm2, %v1175_v25  ;;  %1425 = vmatmul.msk.f32.gmra.mxu1 %vm133_vm2, %v1175_v25 }
 0x22a   :  { %v1179_v17 = vpop.permute.xlu1 %1178 }
 0x258   :  { %v1290_v40 = vpop.f32.mrf.mxu3 }
 0x259   :  { %v1291_v53 = vadd.f32 %v1290_v40, %v1179_v17 }
 0x25b   :  { %v1299_v59 = vadd.f32 %v1534_v8, %v1291_v53 }
 0x25d   :  { %v1307_v13 = vmax.f32 %v1299_v59, 0.0 }
 0x25f   :  { %1433 = vst [vmem:[%s1990_s6 + $0x28] sm:$0xff] %v1307_v13 }
 0x260   :  { %v1293_v22 = vpop.f32.mrf.mxu3 }
 0x261   :  { %v1294_v38 = vadd.f32 %v1293_v22, %v1184_v55 }
 0x262   :  { %v1221_v3 = vpop.f32.mrf.mxu0  ;;  %v1244_v24 = vpop.f32.mrf.mxu1 }
 0x263   :  { %v1303_v43 = vadd.f32 %v1512_v4, %v1294_v38  ;;  %v1267_v42 = vpop.f32.mrf.mxu2  ;;  %v1222_v27 = vadd.f32 %v1221_v3, %v1179_v17  ;;  %v1245_v28 = vadd.f32 %v1244_v24, %v1179_v17 }
 0x264   :  { %v1268_v49 = vadd.f32 %v1267_v42, %v1179_v17 }
 0x265   :  { %v1311_v60 = vmax.f32 %v1303_v43, 0.0  ;;  %v1296_v51 = vadd.f32 %v1222_v27, %v1517_v5  ;;  %v1297_v8 = vadd.f32 %v1245_v28, %v1522_v6 }
 0x266   :  { %v1298_v15 = vadd.f32 %v1529_v7, %v1268_v49 }
 0x267   :  { %1435 = vst [vmem:[%s1990_s6 + $0x38] sm:$0xff] %v1311_v60  ;;  %v1304_v62 = vmax.f32 %v1296_v51, 0.0  ;;  %v1305_v56 = vmax.f32 %v1297_v8, 0.0 }
 0x268   :  { %v1306_v29 = vmax.f32 %v1298_v15, 0.0 }
 0x269   :  { %1312 = vst [vmem:[%s1990_s6] sm:$0xff] %v1304_v62 }
 0x26a   :  { %1313 = vst [vmem:[%s1990_s6 + $0x8] sm:$0xff] %v1305_v56  ;;  %v1224_v4 = vpop.f32.mrf.mxu0  ;;  %v1247_v5 = vpop.f32.mrf.mxu1 }
 0x26b   :  { %1432 = vst [vmem:[%s1990_s6 + $0x20] sm:$0xff] %v1306_v29  ;;  %v1225_v6 = vadd.f32 %v1224_v4, %v1184_v55  ;;  %v1248_v7 = vadd.f32 %v1247_v5, %v1184_v55  ;;  %v1270_v18 = vpop.f32.mrf.mxu2 }
 0x26c   :  { %v1271_v10 = vadd.f32 %v1270_v18, %v1184_v55 }
 0x26d   :  { %v1300_v34 = vadd.f32 %v1225_v6, %v1495_v0  ;;  %v1301_v14 = vadd.f32 %v1248_v7, %v1500_v1 }
 0x26e   :  { %v1302_v20 = vadd.f32 %v1505_v2, %v1271_v10 }
 0x26f   :  { %v1308_v39 = vmax.f32 %v1300_v34, 0.0  ;;  %v1309_v47 = vmax.f32 %v1301_v14, 0.0 }
 0x270   :  { %v1310_v21 = vmax.f32 %v1302_v20, 0.0 }
 0x271   :  { %1314 = vst [vmem:[%s1990_s6 + $0x10] sm:$0xff] %v1308_v39 }
 0x272   :  { %1315 = vst [vmem:[%s1990_s6 + $0x18] sm:$0xff] %v1309_v47 }
 0x273   :  { %1434 = vst [vmem:[%s1990_s6 + $0x30] sm:$0xff] %v1310_v21 }

</bundles_post_ra>
